<compile_context>
chip_gen: v5e
topology: v5e:2x2
jax: 0.10.0
libtpu: 0.0.40
codegen_flags: <defaults>
</compile_context>

<pallas_src>
import math
import numpy as np
import jax
import jax.numpy as jnp
from jax import lax
from jax.experimental import pallas as pl
from jax.experimental.pallas import tpu as pltpu

# ----------------------------- config (small) -------------------------------
B = 2            # batch
L = 8            # sequence length
H = 32           # stand-in "BERT" hidden size (original: 768)
VOCAB = 100      # stand-in vocab (original: 21128)
NH, HD = 4, 8    # mini-bert attention heads / head dim (NH*HD == H)
N_LAYERS = 2     # mini-bert layers

HEADS = 3        # ner_vocab_size == len({'LOC','ORG','PER'})
HEAD_SIZE = 64   # ner_head_size
PROJ = HEADS * 2 * HEAD_SIZE          # 384, column blocks [q0 k0 q1 k1 q2 k2]
BL = B * L
OUT_LANES = B * L * L                 # 128 -> lane-dense output rows
TRIL_PEN = 1e12 / math.sqrt(HEAD_SIZE)  # tril penalty after q-scale folding


# --------------------------- GlobalPointer kernel ---------------------------
def global_pointer_kernel(x_ref, mask_ref, w_ref, b_ref, cos_ref, sin_ref,
                          out_ref):
    """GlobalPointer head, whole (tiny) batch in one invocation.

    x_ref    : (B*L, H)        flattened encoder output
    mask_ref : (B, L)          padding mask (1 = token, 0 = pad), f32
    w_ref    : (H, PROJ)       dense weight (q columns pre-scaled by 1/sqrt(hs))
    b_ref    : (1, PROJ)       dense bias   (q columns pre-scaled)
    cos_ref  : (L, HEAD_SIZE)  RoPE cos table
    sin_ref  : (L, HEAD_SIZE)  RoPE sin table, pre-signed (-sin on even lanes)
    out_ref  : (HEADS, B*L*L)  lane-dense logits; wrapper restores (B,HEADS,L,L)
    """
    # ---- one fused projection for the whole batch (single MXU launch) ------
    x = x_ref[...]                                                # [BL, H]
    proj = jnp.dot(x, w_ref[...],
                   preferred_element_type=jnp.float32) + b_ref[...]  # [BL, PROJ]

    # ---- RoPE ---------------------------------------------------------------
    # Broadcast the [L, HEAD_SIZE] tables over batch rows and over the 2*HEADS
    # q/k column blocks in-kernel (no pre-tiled [B*L, PROJ] tables DMA'd in).
    cos_t = jnp.concatenate([cos_ref[...]] * B, axis=0)           # [BL, hs]
    cos_t = jnp.concatenate([cos_t] * (2 * HEADS), axis=1)        # [BL, PROJ]
    sin_t = jnp.concatenate([sin_ref[...]] * B, axis=0)
    sin_t = jnp.concatenate([sin_t] * (2 * HEADS), axis=1)        # pre-signed

    # rotate-half-adjacent == pairwise swap * (+-1); the sign lives in sin_t.
    # pltpu.roll follows jnp.roll semantics: out[j] = x[(j - shift) % n].
    nxt = pltpu.roll(proj, shift=PROJ - 1, axis=1)   # nxt[j] = proj[j+1]
    prv = pltpu.roll(proj, shift=1, axis=1)          # prv[j] = proj[j-1]
    lane = lax.broadcasted_iota(jnp.int32, (BL, PROJ), 1)
    swap = jnp.where(lane % 2 == 0, nxt, prv)        # swap within (2i, 2i+1)
    proj = proj * cos_t + swap * sin_t               # [BL, PROJ]

    # ---- pairwise scores: ONE batched MXU contraction over (batch, head) ----
    proj3 = proj.reshape(B, L, PROJ)
    q_parts = [proj3[:, :, (2 * h) * HEAD_SIZE:(2 * h + 1) * HEAD_SIZE]
               for h in range(HEADS)]                # HEADS x [B, L, hs]
    k_parts = [proj3[:, :, (2 * h + 1) * HEAD_SIZE:(2 * h + 2) * HEAD_SIZE]
               for h in range(HEADS)]
    qg = jnp.concatenate(q_parts, axis=0)            # [HEADS*B, L, hs]
    kg = jnp.concatenate(k_parts, axis=0)            # [HEADS*B, L, hs]
    scores = lax.dot_general(qg, kg, (((2,), (2,)), ((0,), (0,))),
                             preferred_element_type=jnp.float32)  # [HB, L, L]
    scores = scores.reshape(HEADS, B, L, L)

    # ---- padding + lower-triangle masking (exact original semantics) -------
    mask = mask_ref[...]                                          # [B, L]
    valid = (mask[:, :, None] * mask[:, None, :]) > 0.0           # [B, L, L]
    row = lax.broadcasted_iota(jnp.int32, (L, L), 0)
    col = lax.broadcasted_iota(jnp.int32, (L, L), 1)
    tri_pen = jnp.where(row > col, jnp.float32(TRIL_PEN), jnp.float32(0.0))
    logits = jnp.where(valid[None, :, :, :],
                       scores - tri_pen[None, None, :, :],
                       jnp.float32(-jnp.inf))                     # [H, B, L, L]

    # ---- lane-dense store: (HEADS, B*L*L) = (3, 128) ------------------------
    # Fold l, then b, into lanes with slices + lane-concats; final write is a
    # single unmasked 128-wide store per head row.
    fold_l = jnp.concatenate([logits[:, :, i, :] for i in range(L)],
                             axis=-1)                 # [HEADS, B, L*L]
    flat = jnp.concatenate([fold_l[:, i, :] for i in range(B)],
                           axis=-1)                   # [HEADS, B*L*L]
    out_ref[...] = flat


def global_pointer(sequence_output, mask, w_scaled, b_scaled, cos, sin_signed):
    """sequence_output: [B, L, H] f32; mask: [B, L] (1 = token, 0 = pad)."""
    x2 = sequence_output.reshape(BL, H)
    mask_f = mask.astype(jnp.float32)
    vmem = pltpu.MemorySpace.VMEM
    out2 = pl.pallas_call(
        global_pointer_kernel,
        out_shape=jax.ShapeDtypeStruct((HEADS, OUT_LANES), jnp.float32),
        in_specs=[pl.BlockSpec(memory_space=vmem)] * 6,
        out_specs=pl.BlockSpec(memory_space=vmem),
    )(x2, mask_f, w_scaled, b_scaled, cos, sin_signed)
    out4 = out2.reshape(HEADS, B, L, L)           # lanes were (b, l, m) C-order
    return jnp.transpose(out4, (1, 0, 2, 3))      # [B, HEADS, L, L]


# ------------------ RoPE tables & wrapper-side constant prep ----------------
def make_rope_tables(seq_len, dim):
    # bert4torch sinusoid table; cos/sin duplicated over adjacent pairs.
    i = jnp.arange(dim // 2, dtype=jnp.float32)
    theta = 1.0 / (10000.0 ** (2.0 * i / dim))
    ang = jnp.arange(seq_len, dtype=jnp.float32)[:, None] * theta[None, :]
    cos = jnp.repeat(jnp.cos(ang), 2, axis=-1)        # [L, dim]
    sin = jnp.repeat(jnp.sin(ang), 2, axis=-1)        # [L, dim]
    return cos, sin


def prep_global_pointer_constants(gp_w, gp_b, sin):
    """Fold 1/sqrt(head_size) into the q column blocks; pre-sign the sin table."""
    col = np.arange(PROJ)
    is_q = ((col // HEAD_SIZE) % 2) == 0              # layout [q0 k0 q1 k1 q2 k2]
    scale = np.where(is_q, 1.0 / math.sqrt(HEAD_SIZE), 1.0).astype(np.float32)
    w_s = gp_w * scale[None, :]
    b_s = (gp_b * scale).reshape(1, PROJ)
    # rotate-half-adjacent sign: out[2i] = -x[2i+1], out[2i+1] = +x[2i]
    sgn = np.where(np.arange(HEAD_SIZE) % 2 == 0, -1.0, 1.0).astype(np.float32)
    sin_signed = sin * sgn[None, :]
    return w_s, b_s, sin_signed


# ---------------------- deterministic mini-BERT (glue) ----------------------
def init_params(key):
    ks = list(jax.random.split(key, 64))
    p = {}
    p["emb"] = 0.02 * jax.random.normal(ks.pop(), (VOCAB, H), jnp.float32)
    p["pos"] = 0.02 * jax.random.normal(ks.pop(), (L, H), jnp.float32)
    p["ln0_g"] = jnp.ones((H,), jnp.float32)
    p["ln0_b"] = jnp.zeros((H,), jnp.float32)
    layers = []
    for _ in range(N_LAYERS):
        lp = {
            "wq": 0.02 * jax.random.normal(ks.pop(), (H, H), jnp.float32),
            "wk": 0.02 * jax.random.normal(ks.pop(), (H, H), jnp.float32),
            "wv": 0.02 * jax.random.normal(ks.pop(), (H, H), jnp.float32),
            "wo": 0.02 * jax.random.normal(ks.pop(), (H, H), jnp.float32),
            "w1": 0.02 * jax.random.normal(ks.pop(), (H, 4 * H), jnp.float32),
            "w2": 0.02 * jax.random.normal(ks.pop(), (4 * H, H), jnp.float32),
            "ln1_g": jnp.ones((H,), jnp.float32), "ln1_b": jnp.zeros((H,), jnp.float32),
            "ln2_g": jnp.ones((H,), jnp.float32), "ln2_b": jnp.zeros((H,), jnp.float32),
        }
        layers.append(lp)
    p["layers"] = layers
    # GlobalPointer dense: hidden -> heads * head_size * 2
    p["gp_w"] = 0.02 * jax.random.normal(ks.pop(), (H, PROJ), jnp.float32)
    p["gp_b"] = 0.02 * jax.random.normal(ks.pop(), (PROJ,), jnp.float32)
    return p


def layer_norm(x, g, b, eps=1e-12):
    mu = jnp.mean(x, axis=-1, keepdims=True)
    var = jnp.mean((x - mu) ** 2, axis=-1, keepdims=True)
    return (x - mu) / jnp.sqrt(var + eps) * g + b


def mini_bert(token_ids, p):
    x = p["emb"][token_ids] + p["pos"][None, :, :]
    x = layer_norm(x, p["ln0_g"], p["ln0_b"])
    pad_bias = (1.0 - (token_ids > 0).astype(jnp.float32))[:, None, None, :] * -1e9
    for lp in p["layers"]:
        q = (x @ lp["wq"]).reshape(B, L, NH, HD).transpose(0, 2, 1, 3)
        k = (x @ lp["wk"]).reshape(B, L, NH, HD).transpose(0, 2, 1, 3)
        v = (x @ lp["wv"]).reshape(B, L, NH, HD).transpose(0, 2, 1, 3)
        att = jnp.einsum("bhqd,bhkd->bhqk", q, k) / math.sqrt(HD) + pad_bias
        att = jax.nn.softmax(att, axis=-1)
        ctx = jnp.einsum("bhqk,bhkd->bhqd", att, v).transpose(0, 2, 1, 3).reshape(B, L, H)
        x = layer_norm(x + ctx @ lp["wo"], lp["ln1_g"], lp["ln1_b"])
        ff = jax.nn.gelu(x @ lp["w1"]) @ lp["w2"]
        x = layer_norm(x + ff, lp["ln2_g"], lp["ln2_b"])
    return x  # [B, L, H]


# --------------------------------- forward ----------------------------------
def model_forward(token_ids, params, cos, sin):
    sequence_output = mini_bert(token_ids, params)               # [B, L, H]
    mask = (token_ids > 0).astype(jnp.int32)                     # [B, L]
    w_s, b_s, sin_s = prep_global_pointer_constants(
        params["gp_w"], params["gp_b"], sin)
    logits = global_pointer(sequence_output, mask, w_s, b_s, cos, sin_s)
    return logits                                                # [B, HEADS, L, L]


if __name__ == "__main__":
    params = init_params(jax.random.PRNGKey(42))                 # seed_everything(42)
    cos, sin = make_rope_tables(L, HEAD_SIZE)

    key = jax.random.PRNGKey(0)
    k_tok, _ = jax.random.split(key)
    token_ids = jax.random.randint(k_tok, (B, L), 1, VOCAB, dtype=jnp.int32)
    token_ids = token_ids.at[1, 6:].set(0)                       # some padding

    logits = model_forward(token_ids, params, cos, sin)
    logits = jax.block_until_ready(logits)
    assert logits.shape == (B, HEADS, L, L)
    print("KERNEL_OK")
</pallas_src>

<mosaic_0001>
module attributes {stable_mosaic.version = 11 : i64} {
  func.func @global_pointer_kernel(%arg0: memref<16x32xf32, #tpu.memory_space<vmem>>, %arg1: memref<2x8xf32, #tpu.memory_space<vmem>>, %arg2: memref<32x384xf32, #tpu.memory_space<vmem>>, %arg3: memref<1x384xf32, #tpu.memory_space<vmem>>, %arg4: memref<8x64xf32, #tpu.memory_space<vmem>>, %arg5: memref<8x64xf32, #tpu.memory_space<vmem>>, %arg6: memref<3x128xf32, #tpu.memory_space<vmem>>) attributes {dimension_semantics = [], scalar_prefetch = 0 : i64, scratch_operands = 0 : i64, tpu.core_type = #tpu.core_type<tc>} {
    %c0 = arith.constant 0 : index
    %c0_0 = arith.constant 0 : index
    %0 = vector.load %arg0[%c0, %c0_0] : memref<16x32xf32, #tpu.memory_space<vmem>>, vector<16x32xf32>
    %c0_1 = arith.constant 0 : index
    %c0_2 = arith.constant 0 : index
    %1 = vector.load %arg2[%c0_1, %c0_2] : memref<32x384xf32, #tpu.memory_space<vmem>>, vector<32x384xf32>
    %cst = arith.constant dense<0.000000e+00> : vector<16x384xf32>
    %2 = tpu.matmul %0, %1, %cst {dimension_numbers = #tpu.dot_dimension_numbers<[1], [0], [0], [1], [0, 0, 1, 1], [], []>} : vector<16x32xf32>, vector<32x384xf32>, vector<16x384xf32> -> vector<16x384xf32>
    %c0_3 = arith.constant 0 : index
    %c0_4 = arith.constant 0 : index
    %3 = vector.load %arg3[%c0_3, %c0_4] : memref<1x384xf32, #tpu.memory_space<vmem>>, vector<1x384xf32>
    %4 = vector.broadcast %3 : vector<1x384xf32> to vector<16x384xf32>
    %5 = arith.addf %2, %4 : vector<16x384xf32>
    %c0_5 = arith.constant 0 : index
    %c0_6 = arith.constant 0 : index
    %6 = vector.load %arg4[%c0_5, %c0_6] : memref<8x64xf32, #tpu.memory_space<vmem>>, vector<8x64xf32>
    %7 = tpu.concatenate %6, %6 in 0 : vector<8x64xf32>, vector<8x64xf32> -> vector<16x64xf32>
    %8 = tpu.concatenate %7, %7, %7, %7, %7, %7 in 1 : vector<16x64xf32>, vector<16x64xf32>, vector<16x64xf32>, vector<16x64xf32>, vector<16x64xf32>, vector<16x64xf32> -> vector<16x384xf32>
    %c0_7 = arith.constant 0 : index
    %c0_8 = arith.constant 0 : index
    %9 = vector.load %arg5[%c0_7, %c0_8] : memref<8x64xf32, #tpu.memory_space<vmem>>, vector<8x64xf32>
    %10 = tpu.concatenate %9, %9 in 0 : vector<8x64xf32>, vector<8x64xf32> -> vector<16x64xf32>
    %11 = tpu.concatenate %10, %10, %10, %10, %10, %10 in 1 : vector<16x64xf32>, vector<16x64xf32>, vector<16x64xf32>, vector<16x64xf32>, vector<16x64xf32>, vector<16x64xf32> -> vector<16x384xf32>
    %c383_i32 = arith.constant 383 : i32
    %12 = tpu.dynamic_rotate %5 by %c383_i32 dim 1 : vector<16x384xf32>, i32 -> vector<16x384xf32>
    %c1_i32 = arith.constant 1 : i32
    %13 = tpu.dynamic_rotate %5 by %c1_i32 dim 1 : vector<16x384xf32>, i32 -> vector<16x384xf32>
    %14 = tpu.iota {dimensions = array<i32: 1>} : vector<16x384xi32>
    %c2_i32 = arith.constant 2 : i32
    %c0_i32 = arith.constant 0 : i32
    %15 = arith.cmpi eq, %c2_i32, %c0_i32 : i32
    %c1_i32_9 = arith.constant 1 : i32
    %16 = arith.select %15, %c1_i32_9, %c2_i32 : i32
    %17 = vector.broadcast %16 : i32 to vector<16x384xi32>
    %18 = arith.remsi %14, %17 : vector<16x384xi32>
    %c0_i32_10 = arith.constant 0 : i32
    %19 = vector.broadcast %c0_i32_10 : i32 to vector<16x384xi32>
    %20 = arith.cmpi ne, %18, %19 : vector<16x384xi32>
    %c0_i32_11 = arith.constant 0 : i32
    %21 = vector.broadcast %c0_i32_11 : i32 to vector<16x384xi32>
    %22 = arith.cmpi slt, %18, %21 : vector<16x384xi32>
    %c0_i32_12 = arith.constant 0 : i32
    %23 = arith.cmpi slt, %16, %c0_i32_12 : i32
    %24 = vector.broadcast %23 : i1 to vector<16x384xi1>
    %25 = vector.broadcast %24 : vector<16x384xi1> to vector<16x384xi1>
    %26 = arith.xori %22, %25 : vector<16x384xi1>
    %27 = arith.andi %26, %20 : vector<16x384xi1>
    %28 = vector.broadcast %16 : i32 to vector<16x384xi32>
    %29 = arith.addi %18, %28 : vector<16x384xi32>
    %30 = arith.select %27, %29, %18 : vector<16x384xi1>, vector<16x384xi32>
    %c0_i32_13 = arith.constant 0 : i32
    %31 = vector.broadcast %c0_i32_13 : i32 to vector<16x384xi32>
    %32 = arith.cmpi eq, %30, %31 : vector<16x384xi32>
    %33 = arith.select %32, %12, %13 : vector<16x384xi1>, vector<16x384xf32>
    %34 = arith.mulf %5, %8 : vector<16x384xf32>
    %35 = arith.mulf %33, %11 : vector<16x384xf32>
    %36 = arith.addf %34, %35 : vector<16x384xf32>
    %37 = vector.shape_cast %36 : vector<16x384xf32> to vector<2x8x384xf32>
    %38 = vector.extract_strided_slice %37 {offsets = [0, 0, 0], sizes = [2, 8, 64], strides = [1, 1, 1]} : vector<2x8x384xf32> to vector<2x8x64xf32>
    %39 = vector.extract_strided_slice %37 {offsets = [0, 0, 128], sizes = [2, 8, 64], strides = [1, 1, 1]} : vector<2x8x384xf32> to vector<2x8x64xf32>
    %40 = vector.extract_strided_slice %37 {offsets = [0, 0, 256], sizes = [2, 8, 64], strides = [1, 1, 1]} : vector<2x8x384xf32> to vector<2x8x64xf32>
    %41 = vector.extract_strided_slice %37 {offsets = [0, 0, 64], sizes = [2, 8, 64], strides = [1, 1, 1]} : vector<2x8x384xf32> to vector<2x8x64xf32>
    %42 = vector.extract_strided_slice %37 {offsets = [0, 0, 192], sizes = [2, 8, 64], strides = [1, 1, 1]} : vector<2x8x384xf32> to vector<2x8x64xf32>
    %43 = vector.extract_strided_slice %37 {offsets = [0, 0, 320], sizes = [2, 8, 64], strides = [1, 1, 1]} : vector<2x8x384xf32> to vector<2x8x64xf32>
    %44 = tpu.concatenate %38, %39, %40 in 0 : vector<2x8x64xf32>, vector<2x8x64xf32>, vector<2x8x64xf32> -> vector<6x8x64xf32>
    %45 = tpu.concatenate %41, %42, %43 in 0 : vector<2x8x64xf32>, vector<2x8x64xf32>, vector<2x8x64xf32> -> vector<6x8x64xf32>
    %cst_14 = arith.constant dense<0.000000e+00> : vector<6x8x8xf32>
    %46 = tpu.matmul %44, %45, %cst_14 {dimension_numbers = #tpu.dot_dimension_numbers<[2], [2], [1], [1], [0, 0, 0, 1, 1, 1], [0], [0]>} : vector<6x8x64xf32>, vector<6x8x64xf32>, vector<6x8x8xf32> -> vector<6x8x8xf32>
    %47 = vector.shape_cast %46 : vector<6x8x8xf32> to vector<3x2x8x8xf32>
    %c0_15 = arith.constant 0 : index
    %c0_16 = arith.constant 0 : index
    %48 = vector.load %arg1[%c0_15, %c0_16] : memref<2x8xf32, #tpu.memory_space<vmem>>, vector<2x8xf32>
    %49 = vector.shape_cast %48 : vector<2x8xf32> to vector<2x8x1xf32>
    %50 = vector.shape_cast %48 : vector<2x8xf32> to vector<2x1x8xf32>
    %51 = vector.broadcast %49 : vector<2x8x1xf32> to vector<2x8x8xf32>
    %52 = vector.broadcast %50 : vector<2x1x8xf32> to vector<2x8x8xf32>
    %53 = arith.mulf %51, %52 : vector<2x8x8xf32>
    %cst_17 = arith.constant 0.000000e+00 : f32
    %54 = vector.broadcast %cst_17 : f32 to vector<2x8x8xf32>
    %55 = arith.cmpf ogt, %53, %54 : vector<2x8x8xf32>
    %56 = tpu.iota {dimensions = array<i32: 0>} : vector<8x8xi32>
    %57 = tpu.iota {dimensions = array<i32: 1>} : vector<8x8xi32>
    %58 = arith.cmpi sgt, %56, %57 : vector<8x8xi32>
    %cst_18 = arith.constant 1.250000e+11 : f32
    %cst_19 = arith.constant 0.000000e+00 : f32
    %59 = vector.broadcast %cst_18 : f32 to vector<8x8xf32>
    %60 = vector.broadcast %cst_19 : f32 to vector<8x8xf32>
    %61 = arith.select %58, %59, %60 : vector<8x8xi1>, vector<8x8xf32>
    %62 = vector.shape_cast %55 : vector<2x8x8xi1> to vector<1x2x8x8xi1>
    %63 = vector.shape_cast %61 : vector<8x8xf32> to vector<1x1x8x8xf32>
    %64 = vector.broadcast %63 : vector<1x1x8x8xf32> to vector<3x2x8x8xf32>
    %65 = arith.subf %47, %64 : vector<3x2x8x8xf32>
    %cst_20 = arith.constant 0xFF800000 : f32
    %66 = vector.shape_cast %62 : vector<1x2x8x8xi1> to vector<1x2x8x8xi1>
    %67 = vector.broadcast %66 : vector<1x2x8x8xi1> to vector<3x2x8x8xi1>
    %68 = vector.broadcast %cst_20 : f32 to vector<3x2x8x8xf32>
    %69 = arith.select %67, %65, %68 : vector<3x2x8x8xi1>, vector<3x2x8x8xf32>
    %70 = vector.extract_strided_slice %69 {offsets = [0, 0, 0, 0], sizes = [3, 2, 1, 8], strides = [1, 1, 1, 1]} : vector<3x2x8x8xf32> to vector<3x2x1x8xf32>
    %71 = vector.shape_cast %70 : vector<3x2x1x8xf32> to vector<3x2x8xf32>
    %72 = vector.extract_strided_slice %69 {offsets = [0, 0, 1, 0], sizes = [3, 2, 1, 8], strides = [1, 1, 1, 1]} : vector<3x2x8x8xf32> to vector<3x2x1x8xf32>
    %73 = vector.shape_cast %72 : vector<3x2x1x8xf32> to vector<3x2x8xf32>
    %74 = vector.extract_strided_slice %69 {offsets = [0, 0, 2, 0], sizes = [3, 2, 1, 8], strides = [1, 1, 1, 1]} : vector<3x2x8x8xf32> to vector<3x2x1x8xf32>
    %75 = vector.shape_cast %74 : vector<3x2x1x8xf32> to vector<3x2x8xf32>
    %76 = vector.extract_strided_slice %69 {offsets = [0, 0, 3, 0], sizes = [3, 2, 1, 8], strides = [1, 1, 1, 1]} : vector<3x2x8x8xf32> to vector<3x2x1x8xf32>
    %77 = vector.shape_cast %76 : vector<3x2x1x8xf32> to vector<3x2x8xf32>
    %78 = vector.extract_strided_slice %69 {offsets = [0, 0, 4, 0], sizes = [3, 2, 1, 8], strides = [1, 1, 1, 1]} : vector<3x2x8x8xf32> to vector<3x2x1x8xf32>
    %79 = vector.shape_cast %78 : vector<3x2x1x8xf32> to vector<3x2x8xf32>
    %80 = vector.extract_strided_slice %69 {offsets = [0, 0, 5, 0], sizes = [3, 2, 1, 8], strides = [1, 1, 1, 1]} : vector<3x2x8x8xf32> to vector<3x2x1x8xf32>
    %81 = vector.shape_cast %80 : vector<3x2x1x8xf32> to vector<3x2x8xf32>
    %82 = vector.extract_strided_slice %69 {offsets = [0, 0, 6, 0], sizes = [3, 2, 1, 8], strides = [1, 1, 1, 1]} : vector<3x2x8x8xf32> to vector<3x2x1x8xf32>
    %83 = vector.shape_cast %82 : vector<3x2x1x8xf32> to vector<3x2x8xf32>
    %84 = vector.extract_strided_slice %69 {offsets = [0, 0, 7, 0], sizes = [3, 2, 1, 8], strides = [1, 1, 1, 1]} : vector<3x2x8x8xf32> to vector<3x2x1x8xf32>
    %85 = vector.shape_cast %84 : vector<3x2x1x8xf32> to vector<3x2x8xf32>
    %86 = tpu.concatenate %71, %73, %75, %77, %79, %81, %83, %85 in 2 : vector<3x2x8xf32>, vector<3x2x8xf32>, vector<3x2x8xf32>, vector<3x2x8xf32>, vector<3x2x8xf32>, vector<3x2x8xf32>, vector<3x2x8xf32>, vector<3x2x8xf32> -> vector<3x2x64xf32>
    %87 = vector.extract_strided_slice %86 {offsets = [0, 0, 0], sizes = [3, 1, 64], strides = [1, 1, 1]} : vector<3x2x64xf32> to vector<3x1x64xf32>
    %88 = vector.shape_cast %87 : vector<3x1x64xf32> to vector<3x64xf32>
    %89 = vector.extract_strided_slice %86 {offsets = [0, 1, 0], sizes = [3, 1, 64], strides = [1, 1, 1]} : vector<3x2x64xf32> to vector<3x1x64xf32>
    %90 = vector.shape_cast %89 : vector<3x1x64xf32> to vector<3x64xf32>
    %91 = tpu.concatenate %88, %90 in 1 : vector<3x64xf32>, vector<3x64xf32> -> vector<3x128xf32>
    %c0_21 = arith.constant 0 : index
    %c0_22 = arith.constant 0 : index
    %92 = vector.load %arg6[%c0_21, %c0_22] : memref<3x128xf32, #tpu.memory_space<vmem>>, vector<3x128xf32>
    tpu.vector_store %arg6[%c0_21, %c0_22], %91 {strides = array<i32>} : memref<3x128xf32, #tpu.memory_space<vmem>>, vector<3x128xf32>,
    return
  }
}

</mosaic_0001>

<bundles_post_ra>
// kernel: tpu_custom_call.1
= control target key start
LH: loop header
LB: loop body
LE: loop exit
PB: predicated region body
PF: predicated region fallthrough
CT: control target
= control target key end

     0   :  { %11 = vsyncpa [#allocation3], 0  ;;  %s1255_s0 = inlined_call_operand.hbm [shape: f32[16,32], index: 0, kind: input, shape index: {}]   ;;  %s1256_s1 = inlined_call_operand.hbm [shape: f32[2,8], index: 1, kind: input, shape index: {}]   ;;  %s1257_s2 = inlined_call_operand.hbm [shape: f32[32,384], index: 2, kind: input, shape index: {}]   ;;  %s1258_s3 = inlined_call_operand.hbm [shape: f32[1,384], index: 3, kind: input, shape index: {}]   ;;  %s1259_s4 = inlined_call_operand.hbm [shape: f32[8,64], index: 4, kind: input, shape index: {}]   ;;  %s1260_s5 = inlined_call_operand.hbm [shape: f32[8,64], index: 5, kind: input, shape index: {}]   ;;  %s1261_s6 = inlined_call_operand.hbm [shape: f32[3,128], index: 6, kind: output, shape index: {}]  }
   0x1   :  { %12 = vsyncpa [#allocation6], 0 }
   0x2   :  { %13 = vsyncpa [#allocation9], 0 }
   0x3   :  { %14 = vsyncpa [#allocation12], 0  ;;  %s34_s23 = sshll.u32 %s1256_s1, 4  ;;  %s35_s23 = int_to_ptr.hbm [resolvable:$true] %s34_s23 }
   0x4   :  { %15 = vsyncpa [#allocation4], 0  ;;  %s955_s24 = smov [#allocation5]   ;;  %s58_s28 = sshll.u32 %s1258_s3, 4  ;;  %s59_s28 = int_to_ptr.hbm [resolvable:$true] %s58_s28 }
   0x5   :  { %s36_s25 = sshll.u32 %s955_s24, 4  ;;  %s956_s29 = smov [#allocation8]   ;;  %s37_s25 = int_to_ptr.vmem [resolvable:$true] %s36_s25 }
   0x6   :  { %39 = dma.hbm_to_vmem [thread:$0]  %s35_s23, 32, %s37_s25, [#allocation6]  }
   0x7   :  { %s60_s30 = sshll.u32 %s956_s29, 4  ;;  %s20_s9 = sshll.u32 %s1255_s0, 4  ;;  %s61_s30 = int_to_ptr.vmem [resolvable:$true] %s60_s30  ;;  %s21_s9 = int_to_ptr.hbm [resolvable:$true] %s20_s9 }
   0x8   :  { %63 = dma.hbm_to_vmem [thread:$0]  %s59_s28, 48, %s61_s30, [#allocation9]  }
   0x9   :  { %s957_s1 = smov [#allocation2]   ;;  %s44_s13 = sshll.u32 %s1257_s2, 4  ;;  %s45_s13 = int_to_ptr.hbm [resolvable:$true] %s44_s13 }
   0xa   :  { %s22_s10 = sshll.u32 %s957_s1, 4  ;;  %s958_s14 = smov 128   ;;  %s23_s10 = int_to_ptr.vmem [resolvable:$true] %s22_s10 }
   0xb   :  { %s959_s3 = smov 8   ;;  %s960_s15 = smov [#allocation7]  }
   0xc   :  { %28 = dma.hbm_to_vmem [thread:$0]  %s21_s9, 256, %s23_s10, [#allocation3], %s958_s14, %s958_s14, %s959_s3  }
   0xd   :  { %s46_s16 = sshll.u32 %s960_s15, 4  ;;  %s961_s17 = smov 384   ;;  %s47_s16 = int_to_ptr.vmem [resolvable:$true] %s46_s16 }
   0xe   :  { %s962_s0 = smov 24   ;;  %s69_s20 = sshll.u32 %s1259_s4, 4  ;;  %s70_s20 = int_to_ptr.hbm [resolvable:$true] %s69_s20 }
   0xf   :  { %52 = dma.hbm_to_vmem [thread:$0]  %s45_s13, 1536, %s47_s16, [#allocation6], %s961_s17, %s961_s17, %s962_s0  }
  0x10   :  { %s963_s21 = smov [#allocation10]   ;;  %s80_s24 = sshll.u32 %s1260_s5, 4  ;;  %s81_s24 = int_to_ptr.hbm [resolvable:$true] %s80_s24 }
  0x11   :  { %s71_s22 = sshll.u32 %s963_s21, 4  ;;  %s964_s25 = smov [#allocation11]   ;;  %s72_s22 = int_to_ptr.vmem [resolvable:$true] %s71_s22 }
  0x12   :  { %74 = dma.hbm_to_vmem [thread:$0]  %s70_s20, 128, %s72_s22, [#allocation9]  }
  0x13   :  { %s82_s26 = sshll.u32 %s964_s25, 4  ;;  %s83_s26 = int_to_ptr.vmem [resolvable:$true] %s82_s26 }
  0x14   :  { %85 = dma.hbm_to_vmem [thread:$0]  %s81_s24, 128, %s83_s26, [#allocation12]  }
  0x15   :  { %945 = dma.done.wait [#allocation3], 256  }
  0x16   :  { %946 = vsyncadd [#allocation3], 4294967040 }
  0x17   :  { %947 = dma.done.wait [#allocation6], 1568  }
  0x18   :  { %948 = vsyncadd [#allocation6], 4294965728 }
  0x19   :  { %949 = dma.done.wait [#allocation9], 176  }
  0x1a   :  { %950 = vsyncadd [#allocation9], 4294967120 }
  0x1b   :  { %951 = dma.done.wait [#allocation12], 128  }
  0x1c   :  { %952 = vsyncadd [#allocation12], 4294967168  ;;  %v121_v0 = vld [vmem:[#allocation7 + $0x48] sm:$0xff]  ;;  %v118_v1 = vld [vmem:[#allocation7 + $0x30] sm:$0xff]  ;;  %vm132_vm0 = vcmask 261120   ;;  %s965_s4 = smov 64   ;;  %v233_v32 = vlaneseq }
  0x1d   :  { %v123_v2 = vld [vmem:[#allocation7 + $0x58] sm:$0xff]  ;;  %151 = vmatpush.msra.mxu0 %v121_v0  ;;  %v120_v3 = vld [vmem:[#allocation7 + $0x40] sm:$0xff]  ;;  %v117_v5 = vld [vmem:[#allocation7 + $0x28] sm:$0xff]  ;;  %s966_s5 = smov 1   ;;  %s967_s27 = smov 127   ;;  %vm213_vm1 = vcmask 523264  }
  0x1e   :  { %197 = vmatpush.msra.mxu2 %v123_v2  ;;  %v115_v4 = vld [vmem:[#allocation7 + $0x18] sm:$0xff]  ;;  %v122_v6 = vld [vmem:[#allocation7 + $0x50] sm:$0xff]  ;;  %v112_v8 = vld [vmem:[#allocation7] sm:$0xff]  ;;  %v1046_v34 = vand.u32 127, %v233_v32  ;;  %vm540_vm10 = vcmask 1041409   ;;  %s969_s28 = smov 16  }
  0x1f   :  { %152 = vmatpush.msra.mxu0 %v118_v1  ;;  %v119_v7 = vld [vmem:[#allocation7 + $0x38] sm:$0xff]  ;;  %174 = vmatpush.msra.mxu1 %v122_v6  ;;  %v114_v9 = vld [vmem:[#allocation7 + $0x10] sm:$0xff]  ;;  %v1030_v10 = vld [vmem:[#allocation10] sm:$0xff]  ;;  %s970_s29 = smov 32   ;;  %s971_s30 = smov 40   ;;  %vm672_vm11 = vcmask 64512  }
  0x20   :  { %198 = vmatpush.msra.mxu2 %v120_v3  ;;  %v110_v11 = vld [vmem:[#allocation2] sm:$0xff]  ;;  %v116_v12 = vld [vmem:[#allocation7 + $0x20] sm:$0xff]  ;;  %210 = vrot.lane.b32.xlu2 %v1030_v10, %s965_s4  ;;  %v111_v14 = vld [vmem:[#allocation2 + $0x8] sm:$0xff]  ;;  %v267_v37 = vand.u32 1, %v1046_v34  ;;  %vm254_vm2 = vcmp.lt.s32.totalorder %v1046_v34, 1  ;;  %vm235_vm3 = vcmp.lt.s32.totalorder %v1046_v34, 127 }
  0x21   :  { %153 = vmatpush.msra.mxu0 %v115_v4  ;;  %175 = vmatpush.msra.mxu1 %v119_v7  ;;  %v113_v13 = vld [vmem:[#allocation7 + $0x8] sm:$0xff]  ;;  %v124_v16 = vld [vmem:[#allocation8] sm:$0x7]  ;;  %v261_v53 = vadd.s32 128, %v1046_v34  ;;  %v262_v54 = vadd.s32 256, %v1046_v34  ;;  %s972_s7 = smov 48  }
  0x22   :  { %199 = vmatpush.msra.mxu2 %v117_v5  ;;  %v215_v15 = vld [vmem:[#allocation11] sm:$0xff]  ;;  %v126_v17 = vperm.slane %v124_v16, 0  ;;  %v127_v20 = vperm.slane %v124_v16, 1  ;;  %v128_v21 = vperm.slane %v124_v16, 2  ;;  %vm1051_vm4 = vcmp.eq.s32.totalorder %v267_v37, 0  ;;  %s973_s8 = smov 56  }
  0x23   :  { %154 = vmatpush.msra.mxu0 %v112_v8  ;;  %176 = vmatpush.msra.mxu1 %v116_v12  ;;  %v274_v62 = vand.u32 1, %v261_v53  ;;  %v281_v63 = vand.u32 1, %v262_v54  ;;  %vm676_vm12 = vcmask 130048   ;;  %vm680_vm13 = vcmask 195584   ;;  %s974_s9 = smov [#allocation13]   ;;  %s724_s12 = sshll.u32 %s1261_s6, 4  ;;  %s725_s12 = int_to_ptr.hbm [resolvable:$true] %s724_s12 }
  0x24   :  { %200 = vmatpush.msra.mxu2 %v114_v9  ;;  %737 = vmatmul.msk.f32.vlgmr.msra.gmra.mxu0 %vm132_vm0, %v110_v11  ;;  %vm687_vm14 = vcmask 326656   ;;  %vm691_vm15 = vcmask 392192   ;;  %s722_s1 = sshll.u32 %s974_s9, 4  ;;  %s723_s1 = int_to_ptr.vmem [resolvable:$true] %s722_s1 }
  0x25   :  { %741 = vmatmul.msk.f32.vlgmr.msra.gmra.mxu2 %vm132_vm0, %v110_v11  ;;  %177 = vmatpush.msra.mxu1 %v113_v13  ;;  %vm1074_vm5 = vcmp.eq.s32.totalorder %v274_v62, 0  ;;  %vm1078_vm6 = vcmp.eq.s32.totalorder %v281_v63, 0 }
  0x26   :  { %739 = vmatmul.msk.f32.vlgmr.msra.gmra.mxu1 %vm132_vm0, %v110_v11 }
  0x28   :  { %217 = vrot.lane.b32.xlu2 %v215_v15, %s965_s4 }
  0x2c   :  { %738 = vmatmul.msk.f32.gmra.mxu0 %vm132_vm0, %v111_v14 }
  0x2d   :  { %742 = vmatmul.msk.f32.gmra.mxu2 %vm132_vm0, %v111_v14 }
  0x2e   :  { %740 = vmatmul.msk.f32.gmra.mxu1 %vm132_vm0, %v111_v14 }
  0x7a   :  { %v211_v33 = vpop.permute.xlu2 %210 }
  0x7b   :  { %v214_v40 = vsel %vm213_vm1, %v1030_v10, %v211_v33 }
  0x82   :  { %v218_v38 = vpop.permute.xlu2 %217 }
  0x83   :  { %v220_v41 = vsel %vm213_vm1, %v215_v15, %v218_v38 }
  0xa1   :  { %v156_v18 = vpop.f32.mrf.mxu0 }
  0xa2   :  { %v157_v19 = vadd.f32 %v156_v18, %v126_v17 }
  0xa3   :  { %v179_v22 = vpop.f32.mrf.mxu1 }
  0xa4   :  { %242 = vrot.lane.b32.xlu1 %v157_v19, %s966_s5  ;;  %221 = vrot.lane.b32.xlu0 %v157_v19, %s967_s27  ;;  %v180_v24 = vadd.f32 %v179_v22, %v127_v20  ;;  %v308_v48 = vmul.f32 %v214_v40, %v157_v19 }
  0xa6   :  { %v309_v4 = vmul.f32 %v214_v40, %v180_v24 }
  0xa8   :  { %v202_v23 = vpop.f32.mrf.mxu2 }
  0xa9   :  { %v203_v25 = vadd.f32 %v202_v23, %v128_v21  ;;  %v159_v26 = vpop.f32.mrf.mxu0 }
  0xaa   :  { %v160_v27 = vadd.f32 %v159_v26, %v126_v17 }
  0xab   :  { %v182_v30 = vpop.f32.mrf.mxu1  ;;  %v310_v5 = vmul.f32 %v214_v40, %v203_v25 }
  0xac   :  { %250 = vrot.lane.b32.xlu1 %v203_v25, %s966_s5  ;;  %225 = vrot.lane.b32.xlu0 %v180_v24, %s967_s27  ;;  %v1041_v31 = vadd.f32 %v182_v30, %v127_v20  ;;  %v311_v60 = vmul.f32 %v214_v40, %v160_v27  ;;  %v491_v30 = vshrl.u32 %v233_v32, 7 }
  0xad   :  { %244 = vrot.lane.b32.xlu2 %v160_v27, %s966_s5 }
  0xae   :  { %776 = vset.pattern.permute.xlu0 %v491_v30  ;;  %775 = vset.pattern.permute.xlu2 %v491_v30  ;;  %vm515_vm7 = vcmp.gt.s32.totalorder %v491_v30, %v1046_v34 }
  0xb0   :  { %v205_v28 = vpop.f32.mrf.mxu2 }
  0xb1   :  { %v206_v29 = vadd.f32 %v205_v28, %v128_v21  ;;  %v312_v28 = vmul.f32 %v214_v40, %v1041_v31 }
  0xb3   :  { %v313_v14 = vmul.f32 %v214_v40, %v206_v29 }
  0xb4   :  { %229 = vrot.lane.b32.xlu1 %v203_v25, %s967_s27  ;;  %223 = vrot.lane.b32.xlu0 %v160_v27, %s967_s27 }
  0xb5   :  { %231 = vrot.lane.b32.xlu2 %v206_v29, %s967_s27 }
  0xbc   :  { %227 = vrot.lane.b32.xlu1 %v1041_v31, %s967_s27  ;;  %252 = vrot.lane.b32.xlu0 %v206_v29, %s966_s5 }
  0xc4   :  { %248 = vrot.lane.b32.xlu1 %v1041_v31, %s966_s5  ;;  %246 = vrot.lane.b32.xlu0 %v180_v24, %s966_s5 }
 0x107   :  { %v245_v52 = vpop.permute.xlu2 %244 }
 0x10f   :  { %v232_v1 = vpop.permute.xlu2 %231 }
 0x116   :  { %v243_v35 = vpop.permute.xlu1 %242  ;;  %v222_v36 = vpop.permute.xlu0 %221 }
 0x11e   :  { %v251_v42 = vpop.permute.xlu1 %250  ;;  %v226_v43 = vpop.permute.xlu0 %225 }
 0x11f   :  { %v259_v44 = vsel %vm254_vm2, %v251_v42, %v243_v35  ;;  %v238_v45 = vsel %vm235_vm3, %v222_v36, %v226_v43 }
 0x120   :  { %v302_v46 = vsel %vm1051_vm4, %v238_v45, %v259_v44  ;;  %v968_v45 = vmov 0.0  }
 0x121   :  { %v314_v47 = vmul.f32 %v302_v46, %v220_v41  ;;  %v516_v46 = vsel %vm515_vm7, 1.25e+11, %v968_v45 }
 0x123   :  { %v320_v49 = vadd.f32 %v314_v47, %v308_v48 }
 0x125   :  { %327 = vrot.lane.b32.xlu2 %v320_v49, %s965_s4 }
 0x126   :  { %v230_v50 = vpop.permute.xlu1 %229  ;;  %v224_v51 = vpop.permute.xlu0 %223 }
 0x127   :  { %v236_v6 = vsel %vm235_vm3, %v226_v43, %v230_v50  ;;  %v240_v7 = vsel %vm235_vm3, %v230_v50, %v222_v36  ;;  %v241_v10 = vsel %vm235_vm3, %v232_v1, %v224_v51 }
 0x12e   :  { %v228_v55 = vpop.permute.xlu1 %227  ;;  %v253_v56 = vpop.permute.xlu0 %252 }
 0x12f   :  { %v239_v57 = vsel %vm235_vm3, %v224_v51, %v228_v55  ;;  %v260_v58 = vsel %vm254_vm2, %v253_v56, %v245_v52  ;;  %v237_v22 = vsel %vm235_vm3, %v228_v55, %v232_v1  ;;  %vm705_vm3 = vcmask 1042434  }
 0x130   :  { %v305_v59 = vsel %vm1051_vm4, %v239_v57, %v260_v58 }
 0x131   :  { %v317_v61 = vmul.f32 %v305_v59, %v220_v41 }
 0x133   :  { %v323_v0 = vadd.f32 %v317_v61, %v311_v60 }
 0x135   :  { %354 = vrot.lane.b32.xlu0 %v323_v0, %s965_s4 }
 0x136   :  { %v249_v8 = vpop.permute.xlu1 %248  ;;  %v247_v9 = vpop.permute.xlu0 %246 }
 0x137   :  { %v256_v11 = vsel %vm254_vm2, %v249_v8, %v253_v56  ;;  %v255_v12 = vsel %vm254_vm2, %v247_v9, %v251_v42  ;;  %v257_v13 = vsel %vm254_vm2, %v243_v35, %v247_v9  ;;  %v258_v18 = vsel %vm254_vm2, %v245_v52, %v249_v8  ;;  %v488_v35 = vld [vmem:[#allocation5] sm:$0x3] }
 0x138   :  { %v307_v15 = vsel %vm1078_vm6, %v241_v10, %v256_v11  ;;  %v303_v16 = vsel %vm1074_vm5, %v236_v6, %v257_v13  ;;  %v304_v17 = vsel %vm1078_vm6, %v240_v7, %v255_v12  ;;  %v306_v26 = vsel %vm1074_vm5, %v237_v22, %v258_v18 }
 0x139   :  { %v319_v19 = vmul.f32 %v307_v15, %v220_v41  ;;  %v315_v20 = vmul.f32 %v303_v16, %v220_v41  ;;  %v316_v21 = vmul.f32 %v304_v17, %v220_v41  ;;  %v318_v27 = vmul.f32 %v306_v26, %v220_v41 }
 0x13a   :  { %v496_v36 = vperm.slane %v488_v35, 1  ;;  %v489_v37 = vperm.slane %v488_v35, 0  ;;  %v504_v41 = vrot.slane %v488_v35, 1  ;;  %vm695_vm2 = vcmask 457728  }
 0x13b   :  { %v321_v23 = vadd.f32 %v315_v20, %v309_v4  ;;  %v322_v24 = vadd.f32 %v316_v21, %v310_v5  ;;  %v325_v25 = vadd.f32 %v319_v19, %v313_v14  ;;  %v324_v29 = vadd.f32 %v318_v27, %v312_v28 }
 0x13c   :  { %v506_v47 = vperm.slane %v504_v41, 0 }
 0x13d   :  { %381 = vrot.lane.b32.xlu1 %v321_v23, %s965_s4  ;;  %435 = vrot.lane.b32.xlu0 %v322_v24, %s965_s4 }
 0x13e   :  { %462 = vrot.lane.b32.xlu2 %v325_v25, %s965_s4 }
 0x145   :  { %408 = vrot.lane.b32.xlu1 %v324_v29, %s965_s4  ;;  %501 = vperm.xlu0 %776, %v496_v36  }
 0x146   :  { %494 = vperm.xlu2 %775, %v489_v37  }
 0x17f   :  { %v328_v33 = vpop.permute.xlu2 %327 }
 0x180   :  { %743 = vmatpush.xpose.msk.msra.mxu3 %vm213_vm1, %v328_v33 }
 0x183   :  { %744 = vmatmul.msk.f32.vlgmr.msra.gmra.mxu3 %vm213_vm1, %v320_v49 }
 0x198   :  { %v463_v38 = vpop.permute.xlu2 %462 }
 0x199   :  { %753 = vmatpush.xpose.msk.msrb.mxu2 %vm213_vm1, %v463_v38 }
 0x19c   :  { %754 = vmatmul.msk.f32.vlgmr.msrb.gmra.mxu2 %vm213_vm1, %v325_v25 }
 0x1a0   :  { %v495_v42 = vpop.permute.xlu2 %494 }
 0x1a1   :  { %v509_v43 = vmul.f32 %v495_v42, %v489_v37 }
 0x1a3   :  { %vm511_vm8 = vcmp.gt.f32.partialorder %v509_v43, 0.0 }
 0x1a7   :  { %v355_v31 = vpop.permute.xlu0 %354 }
 0x1a8   :  { %745 = vmatpush.xpose.msk.msrb.mxu3 %vm213_vm1, %v355_v31 }
 0x1ab   :  { %746 = vmatmul.msk.f32.vlgmr.msrb.gmra.mxu3 %vm213_vm1, %v323_v0 }
 0x1af   :  { %v382_v32 = vpop.permute.xlu1 %381  ;;  %v436_v39 = vpop.permute.xlu0 %435 }
 0x1b0   :  { %747 = vmatpush.xpose.msk.msra.mxu3 %vm213_vm1, %v382_v32  ;;  %751 = vmatpush.xpose.msk.msrb.mxu1 %vm213_vm1, %v436_v39 }
 0x1b3   :  { %748 = vmatmul.msk.f32.vlgmr.msra.gmra.mxu3 %vm213_vm1, %v321_v23  ;;  %752 = vmatmul.msk.f32.vlgmr.msrb.gmra.mxu1 %vm213_vm1, %v322_v24 }
 0x1b7   :  { %v409_v40 = vpop.permute.xlu1 %408  ;;  %v502_v48 = vpop.permute.xlu0 %501 }
 0x1b8   :  { %749 = vmatpush.xpose.msk.msrb.mxu0 %vm213_vm1, %v409_v40  ;;  %v510_v50 = vmul.f32 %v506_v47, %v502_v48 }
 0x1ba   :  { %vm512_vm9 = vcmp.gt.f32.partialorder %v510_v50, 0.0 }
 0x1bb   :  { %750 = vmatmul.msk.f32.vlgmr.msrb.gmra.mxu0 %vm213_vm1, %v324_v29 }
 0x206   :  { %v350_v44 = vpop.f32.mrf.mxu3 }
 0x207   :  { %v517_v49 = vsub.f32 %v350_v44, %v516_v46 }
 0x209   :  { %v1126_v52 = vsel %vm511_vm8, %v517_v49, -inf }
 0x20a   :  { %v549_v56 = vrot.slane %v1126_v52, 1  ;;  %v564_v8 = vrot.slane %v1126_v52, 2  ;;  %v582_v22 = vrot.slane %v1126_v52, 3  ;;  %v600_v36 = vrot.slane %v1126_v52, 4 }
 0x20b   :  { %v618_v43 = vrot.slane %v1126_v52, 5 }
 0x21f   :  { %v485_v51 = vpop.f32.mrf.mxu2 }
 0x220   :  { %v522_v53 = vsub.f32 %v485_v51, %v516_v46 }
 0x222   :  { %v1130_v57 = vsel %vm512_vm9, %v522_v53, -inf  ;;  %v636_v53 = vrot.slane %v1126_v52, 6 }
 0x223   :  { %v571_v63 = vrot.slane %v1130_v57, 1  ;;  %v544_v5 = vrot.slane %v1130_v57, 7  ;;  %v589_v16 = vrot.slane %v1130_v57, 2  ;;  %v607_v28 = vrot.slane %v1130_v57, 3 }
 0x224   :  { %v625_v32 = vrot.slane %v1130_v57, 4  ;;  %v643_v47 = vrot.slane %v1130_v57, 5 }
 0x22e   :  { %v377_v54 = vpop.f32.mrf.mxu3 }
 0x22f   :  { %v518_v55 = vsub.f32 %v377_v54, %v516_v46 }
 0x230   :  { %v458_v34 = vpop.f32.mrf.mxu1 }
 0x231   :  { %v1133_v58 = vsel %vm512_vm9, %v518_v55, -inf  ;;  %v521_v59 = vsub.f32 %v458_v34, %v516_v46 }
 0x232   :  { %v550_v60 = vsel %vm540_vm10, %v1133_v58, %v549_v56  ;;  %v565_v4 = vrot.slane %v1133_v58, 1  ;;  %v539_v17 = vrot.slane %v1133_v58, 7  ;;  %v583_v20 = vrot.slane %v1133_v58, 2 }
 0x233   :  { %v1138_v61 = vsel %vm511_vm8, %v521_v59, -inf  ;;  %555 = vrot.lane.b32.xlu1 %v550_v60, %s959_s3  ;;  %v601_v35 = vrot.slane %v1133_v58, 3  ;;  %v619_v42 = vrot.slane %v1133_v58, 4  ;;  %v637_v51 = vrot.slane %v1133_v58, 5 }
 0x234   :  { %v570_v62 = vrot.slane %v1138_v61, 2  ;;  %v553_v0 = vrot.slane %v1138_v61, 1  ;;  %v1154_v9 = vsel %vm540_vm10, %v544_v5, %v1138_v61  ;;  %v566_v12 = vsel %vm540_vm10, %v565_v4, %v564_v8 }
 0x235   :  { %v588_v13 = vrot.slane %v1138_v61, 3  ;;  %v1182_v24 = vsel %vm540_vm10, %v539_v17, %v1126_v52  ;;  %v584_v25 = vsel %vm540_vm10, %v583_v20, %v582_v22  ;;  %v606_v26 = vrot.slane %v1138_v61, 4 }
 0x236   :  { %v404_v1 = vpop.f32.mrf.mxu3  ;;  %v572_v2 = vsel %vm540_vm10, %v571_v63, %v570_v62  ;;  %v554_v3 = vsel %vm540_vm10, %v1130_v57, %v553_v0  ;;  %v602_v37 = vsel %vm540_vm10, %v601_v35, %v600_v36  ;;  %v624_v38 = vrot.slane %v1138_v61, 5 }
 0x237   :  { %v519_v6 = vsub.f32 %v404_v1, %v516_v46  ;;  %577 = vrot.lane.b32.xlu0 %v572_v2, %s969_s28  ;;  %559 = vrot.lane.b32.xlu2 %v554_v3, %s959_s3  ;;  %v590_v18 = vsel %vm540_vm10, %v589_v16, %v588_v13  ;;  %v608_v30 = vsel %vm540_vm10, %v607_v28, %v606_v26  ;;  %v642_v45 = vrot.slane %v1138_v61, 6 }
 0x238   :  { %v431_v7 = vpop.f32.mrf.mxu0  ;;  %v626_v40 = vsel %vm540_vm10, %v625_v32, %v624_v38  ;;  %v620_v44 = vsel %vm540_vm10, %v619_v42, %v618_v43  ;;  %v638_v54 = vsel %vm540_vm10, %v637_v51, %v636_v53  ;;  %v660_v55 = vrot.slane %v1138_v61, 7 }
 0x239   :  { %v1157_v10 = vsel %vm511_vm8, %v519_v6, -inf  ;;  %v520_v11 = vsub.f32 %v431_v7, %v516_v46  ;;  %v644_v49 = vsel %vm540_vm10, %v643_v47, %v642_v45  ;;  %v661_v56 = vrot.slane %v1130_v57, 6 }
 0x23a   :  { %v551_v14 = vrot.slane %v1157_v10, 1  ;;  %v567_v29 = vrot.slane %v1157_v10, 2  ;;  %v585_v39 = vrot.slane %v1157_v10, 3  ;;  %v603_v48 = vrot.slane %v1157_v10, 4 }
 0x23b   :  { %v1163_v15 = vsel %vm512_vm9, %v520_v11, -inf  ;;  %573 = vrot.lane.b32.xlu1 %v566_v12, %s969_s28  ;;  %v621_v59 = vrot.slane %v1157_v10, 5  ;;  %v662_v60 = vsel %vm540_vm10, %v661_v56, %v660_v55  ;;  %v655_v63 = vrot.slane %v1133_v58, 6 }
 0x23c   :  { %v552_v19 = vsel %vm540_vm10, %v1163_v15, %v551_v14  ;;  %v542_v21 = vrot.slane %v1163_v15, 7  ;;  %v568_v27 = vrot.slane %v1163_v15, 1  ;;  %v586_v31 = vrot.slane %v1163_v15, 2 }
 0x23d   :  { %v604_v46 = vrot.slane %v1163_v15, 3  ;;  %v622_v34 = vrot.slane %v1163_v15, 4  ;;  %v654_v0 = vrot.slane %v1126_v52, 7  ;;  %v640_v1 = vrot.slane %v1163_v15, 5 }
 0x23e   :  { %v1178_v23 = vsel %vm540_vm10, %v542_v21, %v1157_v10  ;;  %v569_v33 = vsel %vm540_vm10, %v568_v27, %v567_v29  ;;  %v587_v41 = vsel %vm540_vm10, %v586_v31, %v585_v39  ;;  %v639_v57 = vrot.slane %v1157_v10, 6 }
 0x23f   :  { %595 = vrot.lane.b32.xlu0 %v590_v18, %s962_s0  ;;  %557 = vrot.lane.b32.xlu2 %v552_v19, %s959_s3  ;;  %v605_v50 = vsel %vm540_vm10, %v604_v46, %v603_v48  ;;  %v623_v62 = vsel %vm540_vm10, %v622_v34, %v621_v59  ;;  %v656_v61 = vsel %vm540_vm10, %v655_v63, %v654_v0  ;;  %v658_v3 = vrot.slane %v1163_v15, 6 }
 0x240   :  { %v641_v2 = vsel %vm540_vm10, %v640_v1, %v639_v57  ;;  %v657_v4 = vrot.slane %v1157_v10, 7 }
 0x242   :  { %v659_v58 = vsel %vm540_vm10, %v658_v3, %v657_v4 }
 0x243   :  { %591 = vrot.lane.b32.xlu1 %v584_v25, %s962_s0 }
 0x247   :  { %613 = vrot.lane.b32.xlu0 %v608_v30, %s970_s29  ;;  %575 = vrot.lane.b32.xlu2 %v569_v33, %s969_s28 }
 0x24b   :  { %609 = vrot.lane.b32.xlu1 %v602_v37, %s970_s29 }
 0x24f   :  { %631 = vrot.lane.b32.xlu0 %v626_v40, %s971_s30  ;;  %593 = vrot.lane.b32.xlu2 %v587_v41, %s962_s0 }
 0x253   :  { %627 = vrot.lane.b32.xlu1 %v620_v44, %s971_s30 }
 0x257   :  { %649 = vrot.lane.b32.xlu0 %v644_v49, %s972_s7  ;;  %611 = vrot.lane.b32.xlu2 %v605_v50, %s970_s29 }
 0x25b   :  { %645 = vrot.lane.b32.xlu1 %v638_v54, %s972_s7 }
 0x25f   :  { %667 = vrot.lane.b32.xlu0 %v662_v60, %s973_s8  ;;  %629 = vrot.lane.b32.xlu2 %v623_v62, %s971_s30 }
 0x263   :  { %663 = vrot.lane.b32.xlu1 %v656_v61, %s973_s8 }
 0x267   :  { %647 = vrot.lane.b32.xlu2 %v641_v2, %s972_s7 }
 0x26b   :  { %665 = vrot.lane.b32.xlu1 %v659_v58, %s973_s8 }
 0x291   :  { %v560_v5 = vpop.permute.xlu2 %559 }
 0x292   :  { %v675_v25 = vsel %vm672_vm11, %v1154_v9, %v560_v5 }
 0x299   :  { %v558_v52 = vpop.permute.xlu2 %557 }
 0x29a   :  { %v674_v30 = vsel %vm672_vm11, %v1178_v23, %v558_v52 }
 0x2a1   :  { %v576_v12 = vpop.permute.xlu2 %575 }
 0x2a2   :  { %v678_v37 = vsel %vm676_vm12, %v674_v30, %v576_v12 }
 0x2a5   :  { %v556_v6 = vpop.permute.xlu1 %555 }
 0x2a6   :  { %v673_v22 = vsel %vm672_vm11, %v1182_v24, %v556_v6 }
 0x2a9   :  { %v578_v7 = vpop.permute.xlu0 %577  ;;  %v594_v16 = vpop.permute.xlu2 %593 }
 0x2aa   :  { %v679_v28 = vsel %vm676_vm12, %v675_v25, %v578_v7  ;;  %v682_v32 = vsel %vm680_vm13, %v678_v37, %v594_v16 }
 0x2ad   :  { %v574_v8 = vpop.permute.xlu1 %573 }
 0x2ae   :  { %v677_v26 = vsel %vm676_vm12, %v673_v22, %v574_v8 }
 0x2b1   :  { %v596_v11 = vpop.permute.xlu0 %595  ;;  %v612_v15 = vpop.permute.xlu2 %611 }
 0x2b2   :  { %v683_v33 = vsel %vm680_vm13, %v679_v28, %v596_v11  ;;  %v685_v41 = vsel %vm132_vm0, %v682_v32, %v612_v15 }
 0x2b5   :  { %v592_v13 = vpop.permute.xlu1 %591 }
 0x2b6   :  { %v681_v29 = vsel %vm680_vm13, %v677_v26, %v592_v13 }
 0x2b9   :  { %v614_v14 = vpop.permute.xlu0 %613  ;;  %v630_v10 = vpop.permute.xlu2 %629 }
 0x2ba   :  { %v686_v36 = vsel %vm132_vm0, %v683_v33, %v614_v14  ;;  %v689_v43 = vsel %vm687_vm14, %v685_v41, %v630_v10 }
 0x2bd   :  { %v610_v17 = vpop.permute.xlu1 %609 }
 0x2be   :  { %v684_v35 = vsel %vm132_vm0, %v681_v29, %v610_v17 }
 0x2c1   :  { %v632_v18 = vpop.permute.xlu0 %631  ;;  %v648_v23 = vpop.permute.xlu2 %647 }
 0x2c2   :  { %v690_v38 = vsel %vm687_vm14, %v686_v36, %v632_v18  ;;  %v693_v44 = vsel %vm691_vm15, %v689_v43, %v648_v23 }
 0x2c5   :  { %v628_v19 = vpop.permute.xlu1 %627 }
 0x2c6   :  { %v688_v9 = vsel %vm687_vm14, %v684_v35, %v628_v19 }
 0x2c9   :  { %v650_v21 = vpop.permute.xlu0 %649 }
 0x2ca   :  { %v694_v39 = vsel %vm691_vm15, %v690_v38, %v650_v21 }
 0x2cd   :  { %v646_v20 = vpop.permute.xlu1 %645 }
 0x2ce   :  { %v692_v31 = vsel %vm691_vm15, %v688_v9, %v646_v20 }
 0x2d1   :  { %v668_v24 = vpop.permute.xlu0 %667 }
 0x2d2   :  { %v698_v42 = vsel %vm695_vm2, %v694_v39, %v668_v24 }
 0x2d3   :  { %v710_v47 = vrot.slane %v698_v42, 7  ;;  %v704_v51 = vrot.slane %v698_v42, 6 }
 0x2d5   :  { %v664_v27 = vpop.permute.xlu1 %663 }
 0x2d6   :  { %v696_v40 = vsel %vm695_vm2, %v692_v31, %v664_v27 }
 0x2d7   :  { %v708_v45 = vrot.slane %v696_v40, 1 }
 0x2dd   :  { %v666_v46 = vpop.permute.xlu1 %665 }
 0x2de   :  { %v697_v48 = vsel %vm695_vm2, %v693_v44, %v666_v46 }
 0x2df   :  { %v702_v49 = vrot.slane %v697_v48, 7  ;;  %v709_v50 = vsel %vm540_vm10, %v697_v48, %v708_v45 }
 0x2e0   :  { %v711_v53 = vsel %vm705_vm3, %v710_v47, %v709_v50 }
 0x2e1   :  { %712 = vrot.lane.b32.xlu2 %v711_v53, %s965_s4  ;;  %v703_v54 = vsel %vm540_vm10, %v702_v49, %v696_v40 }
 0x2e2   :  { %v706_v55 = vsel %vm705_vm3, %v704_v51, %v703_v54 }
 0x33b   :  { %v713_v34 = vpop.permute.xlu2 %712 }
 0x33c   :  { %v715_v56 = vsel %vm213_vm1, %v706_v55, %v713_v34 }
 0x33d   :  { %716 = vst [vmem:[#allocation13] sm:$0x7] %v715_v56 }
 0x33e   :  { %727 = dma.vmem_to_hbm [thread:$0]  %s723_s1, 64, %s725_s12, [#allocation4]  }
 0x33f   :  { %953 = dma.done.wait [#allocation4], 64  }
 0x340   :  { %954 = vsyncadd [#allocation4], 4294967232 }
 0x341   :  { %732 = vsyncpa [#allocation3], 1 }
 0x342   :  { %733 = vsyncpa [#allocation6], 1 }
 0x343   :  { %734 = vsyncpa [#allocation9], 1 }
 0x344   :  { %735 = vsyncpa [#allocation12], 1 }
 0x345   :  { %736 = vsyncpa [#allocation4], 1 }

</bundles_post_ra>
